<compile_context>
chip_gen: v7x
topology: tpu7x:2x2x1
jax: 0.10.0
libtpu: 0.0.40
codegen_flags: <defaults>
</compile_context>

<pallas_src>
import jax
import jax.numpy as jnp
from jax.experimental import pallas as pl
from jax.experimental.pallas import tpu as pltpu

_NEG_INF = -1e30


def _round_up(n, m):
    return ((n + m - 1) // m) * m


def _pad2(a, rows, cols, fill=0.0):
    return jnp.pad(a, ((0, rows - a.shape[0]), (0, cols - a.shape[1])),
                   constant_values=fill)


def chi2_kernel(x_ref, w1_ref, b1_ref,
                wr1_ref, br1_ref, wr2_ref, br2_ref,
                w3_ref, b3_ref, o_ref):
    x = x_ref[...]                                                   # [TB, IN_PAD] bf16

    # Linear(in_dim, n_hidden) + ReLU       (bf16 operands, f32 accumulate)
    h = jnp.dot(x, w1_ref[...], preferred_element_type=jnp.float32) + b1_ref[...]
    h = jnp.maximum(h, 0.0)                                          # [TB, H_PAD] f32

    # FullResLayer: relu( Linear -> ReLU -> Linear + h )
    t = jnp.dot(h.astype(jnp.bfloat16), wr1_ref[...],
                preferred_element_type=jnp.float32) + br1_ref[...]
    t = jnp.maximum(t, 0.0)
    t = jnp.dot(t.astype(jnp.bfloat16), wr2_ref[...],
                preferred_element_type=jnp.float32) + br2_ref[...]
    r = jnp.maximum(t + h, 0.0)                                      # [TB, H_PAD] f32

    # Linear(n_hidden, out_dim) + Softmax over the padded (lane-dense) width.
    logits = jnp.dot(r.astype(jnp.bfloat16), w3_ref[...],
                     preferred_element_type=jnp.float32) + b3_ref[...]
    m = jnp.max(logits, axis=-1, keepdims=True)
    e = jnp.exp(logits - m)                                          # padded lanes -> 0
    s = jnp.sum(e, axis=-1, keepdims=True)
    o_ref[...] = e * pl.reciprocal(s, approx=True)                   # [TB, OUT_PAD] f32


def chi2_baseline_forward(x_full, x_ids, params):
    """x_full: [B, full_dim] float32. Returns [B, out_dim] softmax probs (f32)."""
    # _preprocess: column gather (plain-JAX glue, outside the kernel).
    x = x_full[:, x_ids]                                             # [B, in_dim]

    w1, b1, wr1, br1, wr2, br2, w3, b3 = params
    B, in_dim = x.shape
    n_hidden = w1.shape[1]
    out_dim = w3.shape[1]

    # Lane-dense padded dimensions.
    IN_PAD = _round_up(in_dim, 128)
    H_PAD = _round_up(n_hidden, 128)
    OUT_PAD = _round_up(out_dim, 128)

    # Batch tile: multiple of 8 (sublane), capped at 256.
    TB = min(256, _round_up(B, 8))
    B_PAD = _round_up(B, TB)
    grid = (B_PAD // TB,)

    # Pad + cast operands.  Zero padding is exact through ReLU / residual add;
    # the padded output-bias lanes get -1e30 so softmax assigns them ~0 mass.
    xp = _pad2(x, B_PAD, IN_PAD).astype(jnp.bfloat16)
    w1p = _pad2(w1, IN_PAD, H_PAD).astype(jnp.bfloat16)
    wr1p = _pad2(wr1, H_PAD, H_PAD).astype(jnp.bfloat16)
    wr2p = _pad2(wr2, H_PAD, H_PAD).astype(jnp.bfloat16)
    w3p = _pad2(w3, H_PAD, OUT_PAD).astype(jnp.bfloat16)
    b1p = _pad2(b1, 1, H_PAD).astype(jnp.float32)
    br1p = _pad2(br1, 1, H_PAD).astype(jnp.float32)
    br2p = _pad2(br2, 1, H_PAD).astype(jnp.float32)
    b3p = _pad2(b3, 1, OUT_PAD, fill=_NEG_INF).astype(jnp.float32)

    # Explicit VMEM budget: double-buffered weights + tiles + f32 intermediates.
    wbytes = 2 * ((IN_PAD * H_PAD + 2 * H_PAD * H_PAD + H_PAD * OUT_PAD) * 2
                  + (3 * H_PAD + OUT_PAD) * 4)
    tbytes = 2 * (TB * IN_PAD * 2 + TB * OUT_PAD * 4)
    sbytes = 6 * TB * H_PAD * 4
    vmem_limit = min(max(wbytes + tbytes + sbytes + (8 << 20), 32 << 20), 64 << 20)

    const_map = lambda i: (0, 0)
    out_p = pl.pallas_call(
        chi2_kernel,
        out_shape=jax.ShapeDtypeStruct((B_PAD, OUT_PAD), jnp.float32),
        grid=grid,
        in_specs=[
            pl.BlockSpec((TB, IN_PAD), lambda i: (i, 0)),       # x tile
            pl.BlockSpec((IN_PAD, H_PAD), const_map),           # w1
            pl.BlockSpec((1, H_PAD), const_map),                # b1
            pl.BlockSpec((H_PAD, H_PAD), const_map),            # wr1
            pl.BlockSpec((1, H_PAD), const_map),                # br1
            pl.BlockSpec((H_PAD, H_PAD), const_map),            # wr2
            pl.BlockSpec((1, H_PAD), const_map),                # br2
            pl.BlockSpec((H_PAD, OUT_PAD), const_map),          # w3
            pl.BlockSpec((1, OUT_PAD), const_map),              # b3
        ],
        out_specs=pl.BlockSpec((TB, OUT_PAD), lambda i: (i, 0)),
        compiler_params=pltpu.CompilerParams(
            dimension_semantics=("parallel",),
            vmem_limit_bytes=vmem_limit,
        ),
    )(xp, w1p, b1p, wr1p, br1p, wr2p, br2p, w3p, b3p)

    return out_p[:B, :out_dim]


def _init_linear(key, fan_in, fan_out):
    """PyTorch nn.Linear default init: U(-1/sqrt(fan_in), 1/sqrt(fan_in))."""
    kw, kb = jax.random.split(key)
    bound = 1.0 / jnp.sqrt(fan_in)
    w = jax.random.uniform(kw, (fan_in, fan_out), jnp.float32, -bound, bound)
    b = jax.random.uniform(kb, (1, fan_out), jnp.float32, -bound, bound)
    return w, b


def _reference_forward(x_full, x_ids, params):
    """Pure-JAX f32 reference of the eval-mode PyTorch forward."""
    w1, b1, wr1, br1, wr2, br2, w3, b3 = params
    x = x_full[:, x_ids]
    h = jnp.maximum(x @ w1 + b1, 0.0)
    t = jnp.maximum(h @ wr1 + br1, 0.0)
    t = t @ wr2 + br2
    r = jnp.maximum(t + h, 0.0)
    logits = r @ w3 + b3
    return jax.nn.softmax(logits, axis=-1)


if __name__ == "__main__":
    # Small synthetic config: full feature dim 16, x_ids selects 8 columns,
    # n_hidden=32, out_dim=3 ("possibility of three class"), batch=4.
    key = jax.random.PRNGKey(0)
    k_x, k1, k2, k3, k4 = jax.random.split(key, 5)

    batch, full_dim, in_dim, n_hidden, out_dim = 4, 16, 8, 32, 3
    x_ids = jnp.arange(0, full_dim, 2, dtype=jnp.int32)             # 8 ids

    x_full = jax.random.normal(k_x, (batch, full_dim), jnp.float32)

    w1, b1 = _init_linear(k1, in_dim, n_hidden)       # Linear(in_dim, n_hidden)
    wr1, br1 = _init_linear(k2, n_hidden, n_hidden)   # FullResLayer linear 1
    wr2, br2 = _init_linear(k3, n_hidden, n_hidden)   # FullResLayer linear 2
    w3, b3 = _init_linear(k4, n_hidden, out_dim)      # Linear(n_hidden, out_dim)
    params = (w1, b1, wr1, br1, wr2, br2, w3, b3)

    out = chi2_baseline_forward(x_full, x_ids, params)
    out = jax.block_until_ready(out)

    # Sanity: shape, rows sum to ~1 (approx reciprocal), matches f32 reference
    # to within bf16-operand tolerance.
    ref = _reference_forward(x_full, x_ids, params)
    assert out.shape == (batch, out_dim)
    assert jnp.allclose(jnp.sum(out, axis=-1), 1.0, atol=5e-3)
    assert jnp.max(jnp.abs(out - ref)) < 5e-2

    print("KERNEL_OK")
</pallas_src>

<mosaic_0001>
module attributes {stable_mosaic.version = 11 : i64} {
  func.func @chi2_kernel(%arg0: i32, %arg1: memref<8x128xbf16, #tpu.memory_space<vmem>>, %arg2: memref<128x128xbf16, #tpu.memory_space<vmem>>, %arg3: memref<1x128xf32, #tpu.memory_space<vmem>>, %arg4: memref<128x128xbf16, #tpu.memory_space<vmem>>, %arg5: memref<1x128xf32, #tpu.memory_space<vmem>>, %arg6: memref<128x128xbf16, #tpu.memory_space<vmem>>, %arg7: memref<1x128xf32, #tpu.memory_space<vmem>>, %arg8: memref<128x128xbf16, #tpu.memory_space<vmem>>, %arg9: memref<1x128xf32, #tpu.memory_space<vmem>>, %arg10: memref<8x128xf32, #tpu.memory_space<vmem>>) attributes {dimension_semantics = [#tpu.dimension_semantics<parallel>], iteration_bounds = array<i64: 1>, scalar_prefetch = 0 : i64, scratch_operands = 0 : i64, tpu.core_type = #tpu.core_type<tc>, window_params = [{transform_indices = @transform_0, window_bounds = array<i64: 8, 128>}, {pipeline_mode = #tpu.pipeline_mode<synchronous>, transform_indices = @transform_1, window_bounds = array<i64: 128, 128>}, {pipeline_mode = #tpu.pipeline_mode<synchronous>, transform_indices = @transform_2, window_bounds = array<i64: 1, 128>}, {pipeline_mode = #tpu.pipeline_mode<synchronous>, transform_indices = @transform_3, window_bounds = array<i64: 128, 128>}, {pipeline_mode = #tpu.pipeline_mode<synchronous>, transform_indices = @transform_4, window_bounds = array<i64: 1, 128>}, {pipeline_mode = #tpu.pipeline_mode<synchronous>, transform_indices = @transform_5, window_bounds = array<i64: 128, 128>}, {pipeline_mode = #tpu.pipeline_mode<synchronous>, transform_indices = @transform_6, window_bounds = array<i64: 1, 128>}, {pipeline_mode = #tpu.pipeline_mode<synchronous>, transform_indices = @transform_7, window_bounds = array<i64: 128, 128>}, {pipeline_mode = #tpu.pipeline_mode<synchronous>, transform_indices = @transform_8, window_bounds = array<i64: 1, 128>}, {transform_indices = @transform_9, window_bounds = array<i64: 8, 128>}]} {
    %c0 = arith.constant 0 : index
    %c0_0 = arith.constant 0 : index
    %0 = vector.load %arg1[%c0, %c0_0] : memref<8x128xbf16, #tpu.memory_space<vmem>>, vector<8x128xbf16>
    %c0_1 = arith.constant 0 : index
    %c0_2 = arith.constant 0 : index
    %1 = vector.load %arg2[%c0_1, %c0_2] : memref<128x128xbf16, #tpu.memory_space<vmem>>, vector<128x128xbf16>
    %cst = arith.constant dense<0.000000e+00> : vector<8x128xf32>
    %2 = tpu.matmul %0, %1, %cst {dimension_numbers = #tpu.dot_dimension_numbers<[1], [0], [0], [1], [0, 0, 1, 1], [], []>} : vector<8x128xbf16>, vector<128x128xbf16>, vector<8x128xf32> -> vector<8x128xf32>
    %c0_3 = arith.constant 0 : index
    %c0_4 = arith.constant 0 : index
    %3 = vector.load %arg3[%c0_3, %c0_4] : memref<1x128xf32, #tpu.memory_space<vmem>>, vector<1x128xf32>
    %4 = vector.broadcast %3 : vector<1x128xf32> to vector<8x128xf32>
    %5 = arith.addf %2, %4 : vector<8x128xf32>
    %cst_5 = arith.constant 0.000000e+00 : f32
    %6 = vector.broadcast %cst_5 : f32 to vector<8x128xf32>
    %7 = arith.maximumf %5, %6 : vector<8x128xf32>
    %8 = arith.truncf %7 : vector<8x128xf32> to vector<8x128xbf16>
    %c0_6 = arith.constant 0 : index
    %c0_7 = arith.constant 0 : index
    %9 = vector.load %arg4[%c0_6, %c0_7] : memref<128x128xbf16, #tpu.memory_space<vmem>>, vector<128x128xbf16>
    %cst_8 = arith.constant dense<0.000000e+00> : vector<8x128xf32>
    %10 = tpu.matmul %8, %9, %cst_8 {dimension_numbers = #tpu.dot_dimension_numbers<[1], [0], [0], [1], [0, 0, 1, 1], [], []>} : vector<8x128xbf16>, vector<128x128xbf16>, vector<8x128xf32> -> vector<8x128xf32>
    %c0_9 = arith.constant 0 : index
    %c0_10 = arith.constant 0 : index
    %11 = vector.load %arg5[%c0_9, %c0_10] : memref<1x128xf32, #tpu.memory_space<vmem>>, vector<1x128xf32>
    %12 = vector.broadcast %11 : vector<1x128xf32> to vector<8x128xf32>
    %13 = arith.addf %10, %12 : vector<8x128xf32>
    %cst_11 = arith.constant 0.000000e+00 : f32
    %14 = vector.broadcast %cst_11 : f32 to vector<8x128xf32>
    %15 = arith.maximumf %13, %14 : vector<8x128xf32>
    %16 = arith.truncf %15 : vector<8x128xf32> to vector<8x128xbf16>
    %c0_12 = arith.constant 0 : index
    %c0_13 = arith.constant 0 : index
    %17 = vector.load %arg6[%c0_12, %c0_13] : memref<128x128xbf16, #tpu.memory_space<vmem>>, vector<128x128xbf16>
    %cst_14 = arith.constant dense<0.000000e+00> : vector<8x128xf32>
    %18 = tpu.matmul %16, %17, %cst_14 {dimension_numbers = #tpu.dot_dimension_numbers<[1], [0], [0], [1], [0, 0, 1, 1], [], []>} : vector<8x128xbf16>, vector<128x128xbf16>, vector<8x128xf32> -> vector<8x128xf32>
    %c0_15 = arith.constant 0 : index
    %c0_16 = arith.constant 0 : index
    %19 = vector.load %arg7[%c0_15, %c0_16] : memref<1x128xf32, #tpu.memory_space<vmem>>, vector<1x128xf32>
    %20 = vector.broadcast %19 : vector<1x128xf32> to vector<8x128xf32>
    %21 = arith.addf %18, %20 : vector<8x128xf32>
    %22 = arith.addf %21, %7 : vector<8x128xf32>
    %cst_17 = arith.constant 0.000000e+00 : f32
    %23 = vector.broadcast %cst_17 : f32 to vector<8x128xf32>
    %24 = arith.maximumf %22, %23 : vector<8x128xf32>
    %25 = arith.truncf %24 : vector<8x128xf32> to vector<8x128xbf16>
    %c0_18 = arith.constant 0 : index
    %c0_19 = arith.constant 0 : index
    %26 = vector.load %arg8[%c0_18, %c0_19] : memref<128x128xbf16, #tpu.memory_space<vmem>>, vector<128x128xbf16>
    %cst_20 = arith.constant dense<0.000000e+00> : vector<8x128xf32>
    %27 = tpu.matmul %25, %26, %cst_20 {dimension_numbers = #tpu.dot_dimension_numbers<[1], [0], [0], [1], [0, 0, 1, 1], [], []>} : vector<8x128xbf16>, vector<128x128xbf16>, vector<8x128xf32> -> vector<8x128xf32>
    %c0_21 = arith.constant 0 : index
    %c0_22 = arith.constant 0 : index
    %28 = vector.load %arg9[%c0_21, %c0_22] : memref<1x128xf32, #tpu.memory_space<vmem>>, vector<1x128xf32>
    %29 = vector.broadcast %28 : vector<1x128xf32> to vector<8x128xf32>
    %30 = arith.addf %27, %29 : vector<8x128xf32>
    %cst_23 = arith.constant dense<0xFF800000> : vector<8xf32>
    %31 = vector.multi_reduction <maximumf>, %30, %cst_23 [1] : vector<8x128xf32> to vector<8xf32>
    %32 = vector.shape_cast %31 : vector<8xf32> to vector<8x1xf32>
    %33 = vector.broadcast %32 : vector<8x1xf32> to vector<8x128xf32>
    %34 = arith.subf %30, %33 : vector<8x128xf32>
    %35 = math.exp %34 : vector<8x128xf32>
    %cst_24 = arith.constant dense<0.000000e+00> : vector<8xf32>
    %36 = vector.multi_reduction <add>, %35, %cst_24 [1] : vector<8x128xf32> to vector<8xf32>
    %37 = vector.shape_cast %36 : vector<8xf32> to vector<8x1xf32>
    %38 = tpu.reciprocal %37 {approx = true} : vector<8x1xf32> -> vector<8x1xf32>
    %39 = vector.broadcast %38 : vector<8x1xf32> to vector<8x128xf32>
    %40 = arith.mulf %35, %39 : vector<8x128xf32>
    %c0_25 = arith.constant 0 : index
    %c0_26 = arith.constant 0 : index
    %41 = vector.load %arg10[%c0_25, %c0_26] : memref<8x128xf32, #tpu.memory_space<vmem>>, vector<8x128xf32>
    tpu.vector_store %arg10[%c0_25, %c0_26], %40 {strides = array<i32>} : memref<8x128xf32, #tpu.memory_space<vmem>>, vector<8x128xf32>,
    return
  }
  func.func @transform_0(%arg0: i32) -> (i32, i32) {
    %c0_i32 = arith.constant 0 : i32
    %c0_i32_0 = arith.constant 0 : i32
    return %arg0, %c0_i32 : i32, i32
  }
  func.func @transform_1(%arg0: i32) -> (i32, i32) {
    %c0_i32 = arith.constant 0 : i32
    %c0_i32_0 = arith.constant 0 : i32
    %c0_i32_1 = arith.constant 0 : i32
    return %c0_i32, %c0_i32_0 : i32, i32
  }
  func.func @transform_2(%arg0: i32) -> (i32, i32) {
    %c0_i32 = arith.constant 0 : i32
    %c0_i32_0 = arith.constant 0 : i32
    %c0_i32_1 = arith.constant 0 : i32
    return %c0_i32, %c0_i32_0 : i32, i32
  }
  func.func @transform_3(%arg0: i32) -> (i32, i32) {
    %c0_i32 = arith.constant 0 : i32
    %c0_i32_0 = arith.constant 0 : i32
    %c0_i32_1 = arith.constant 0 : i32
    return %c0_i32, %c0_i32_0 : i32, i32
  }
  func.func @transform_4(%arg0: i32) -> (i32, i32) {
    %c0_i32 = arith.constant 0 : i32
    %c0_i32_0 = arith.constant 0 : i32
    %c0_i32_1 = arith.constant 0 : i32
    return %c0_i32, %c0_i32_0 : i32, i32
  }
  func.func @transform_5(%arg0: i32) -> (i32, i32) {
    %c0_i32 = arith.constant 0 : i32
    %c0_i32_0 = arith.constant 0 : i32
    %c0_i32_1 = arith.constant 0 : i32
    return %c0_i32, %c0_i32_0 : i32, i32
  }
  func.func @transform_6(%arg0: i32) -> (i32, i32) {
    %c0_i32 = arith.constant 0 : i32
    %c0_i32_0 = arith.constant 0 : i32
    %c0_i32_1 = arith.constant 0 : i32
    return %c0_i32, %c0_i32_0 : i32, i32
  }
  func.func @transform_7(%arg0: i32) -> (i32, i32) {
    %c0_i32 = arith.constant 0 : i32
    %c0_i32_0 = arith.constant 0 : i32
    %c0_i32_1 = arith.constant 0 : i32
    return %c0_i32, %c0_i32_0 : i32, i32
  }
  func.func @transform_8(%arg0: i32) -> (i32, i32) {
    %c0_i32 = arith.constant 0 : i32
    %c0_i32_0 = arith.constant 0 : i32
    %c0_i32_1 = arith.constant 0 : i32
    return %c0_i32, %c0_i32_0 : i32, i32
  }
  func.func @transform_9(%arg0: i32) -> (i32, i32) {
    %c0_i32 = arith.constant 0 : i32
    %c0_i32_0 = arith.constant 0 : i32
    return %arg0, %c0_i32 : i32, i32
  }
}

</mosaic_0001>

<bundles_post_ra>
// kernel: tpu_custom_call.1
= control target key start
LH: loop header
LB: loop body
LE: loop exit
PB: predicated region body
PF: predicated region fallthrough
CT: control target
= control target key end

     0   :  { %14 = vsyncpa [#allocation3], 0  ;;  %s1113_s0 = inlined_call_operand.hbm [shape: bf16[8,128], index: 0, kind: input, shape index: {}]   ;;  %s1114_s1 = inlined_call_operand.hbm [shape: bf16[128,128], index: 1, kind: input, shape index: {}]   ;;  %s1115_s2 = inlined_call_operand.vmem [shape: f32[1,128], index: 2, kind: input, shape index: {}]   ;;  %s1116_s3 = inlined_call_operand.hbm [shape: bf16[128,128], index: 3, kind: input, shape index: {}]   ;;  %s1117_s4 = inlined_call_operand.vmem [shape: f32[1,128], index: 4, kind: input, shape index: {}]   ;;  %s1118_s5 = inlined_call_operand.hbm [shape: bf16[128,128], index: 5, kind: input, shape index: {}]   ;;  %s1119_s6 = inlined_call_operand.vmem [shape: f32[1,128], index: 6, kind: input, shape index: {}]   ;;  %s1120_s7 = inlined_call_operand.hbm [shape: bf16[128,128], index: 7, kind: input, shape index: {}]   ;;  %s1121_s8 = inlined_call_operand.vmem [shape: f32[1,128], index: 8, kind: input, shape index: {}]   ;;  %s1122_s9 = inlined_call_operand.hbm [shape: f32[8,128], index: 9, kind: output, shape index: {}]  }
   0x1   :  { %15 = vsyncpa [#allocation6], 0 }
   0x2   :  { %16 = vsyncpa [#allocation9], 0 }
   0x3   :  { %17 = vsyncpa [#allocation4], 0  ;;  %s917_s30 = smov [#allocation5]   ;;  %s777_s13 = scalar_lea.hbm %s1114_s1, 1024 }
   0x4   :  { %s33_s10 = sshll.u32 %s917_s30, 4  ;;  %p778_p0 = scmp.ne.s32.totalorder %s1114_s1, %s777_s13  ;;  %s34_s10 = int_to_ptr.vmem [resolvable:$true] %s33_s10 }
   0x5   :  { %p781_p1 = scmp.lt.u32.totalorder %s777_s13, %s1114_s1 }
   0x7   :  { %p783_p2 = pnand %p781_p1, %p778_p0 }
   0x9   :  { %786 = shalt.err (!%p783_p2)
}
   0xa   :  { %s787_s18 = scalar_lea.vmem %s34_s10, 1024  ;;  %p792_p4 = scmp.lt.s32.totalorder %s34_s10, %s34_s10 }
   0xb   :  { %p788_p3 = scmp.ne.s32.totalorder %s34_s10, %s787_s18  ;;  %p793_p5 = scmp.lt.s32.totalorder %s787_s18, %s787_s18 }
   0xd   :  { %p794_p6 = por %p793_p5, %p792_p4 }
   0xf   :  { %p795_p7 = pnand %p794_p6, %p788_p3 }
  0x11   :  { %798 = shalt.err (!%p795_p7)
}
  0x12   :  { %s918_s19 = smov 64   ;;  %s919_s20 = smov 4  }
  0x13   :  { %39 = dma.hbm_to_vmem [thread:$0]  %s1114_s1, 1024, %s34_s10, [#allocation6], %s918_s19, %s918_s19, %s919_s20  }
  0x14   :  { %s920_s23 = smov [#allocation8]   ;;  %s921_s25 = smov [#allocation2]  }
  0x15   :  { %s61_s24 = sshll.u32 %s920_s23, 4  ;;  %s24_s26 = sshll.u32 %s921_s25, 4  ;;  %s62_s24 = int_to_ptr.vmem [resolvable:$true] %s61_s24  ;;  %s25_s26 = int_to_ptr.vmem [resolvable:$true] %s24_s26 }
  0x16   :  { %s799_s29 = scalar_lea.hbm %s1118_s5, 1024 }
  0x17   :  { %p800_p8 = scmp.ne.s32.totalorder %s1118_s5, %s799_s29  ;;  %p803_p9 = scmp.lt.u32.totalorder %s799_s29, %s1118_s5 }
  0x19   :  { %p805_p10 = pnand %p803_p9, %p800_p8 }
  0x1b   :  { %808 = shalt.err (!%p805_p10)
}
  0x1c   :  { %s809_s1 = scalar_lea.vmem %s62_s24, 1024  ;;  %p814_p12 = scmp.lt.s32.totalorder %s62_s24, %s62_s24 }
  0x1d   :  { %p810_p11 = scmp.ne.s32.totalorder %s62_s24, %s809_s1  ;;  %p815_p13 = scmp.lt.s32.totalorder %s809_s1, %s809_s1 }
  0x1f   :  { %p816_p0 = por %p815_p13, %p814_p12 }
  0x21   :  { %p817_p1 = pnand %p816_p0, %p810_p11 }
  0x23   :  { %820 = shalt.err (!%p817_p1)
}
  0x24   :  { %67 = dma.hbm_to_vmem [thread:$0]  %s1118_s5, 1024, %s62_s24, [#allocation9], %s918_s19, %s918_s19, %s919_s20  }
  0x25   :  { %s821_s17 = scalar_lea.hbm %s1113_s0, 64 }
  0x26   :  { %p822_p2 = scmp.ne.s32.totalorder %s1113_s0, %s821_s17  ;;  %p825_p3 = scmp.lt.u32.totalorder %s821_s17, %s1113_s0 }
  0x28   :  { %p827_p4 = pnand %p825_p3, %p822_p2 }
  0x2a   :  { %830 = shalt.err (!%p827_p4)
}
  0x2b   :  { %s831_s25 = scalar_lea.vmem %s25_s26, 64  ;;  %p836_p6 = scmp.lt.s32.totalorder %s25_s26, %s25_s26 }
  0x2c   :  { %p832_p5 = scmp.ne.s32.totalorder %s25_s26, %s831_s25  ;;  %p837_p7 = scmp.lt.s32.totalorder %s831_s25, %s831_s25 }
  0x2e   :  { %p838_p8 = por %p837_p7, %p836_p6 }
  0x30   :  { %p839_p9 = pnand %p838_p8, %p832_p5 }
  0x32   :  { %842 = shalt.err (!%p839_p9)
}
  0x33   :  { %27 = dma.hbm_to_vmem [thread:$0]  %s1113_s0, 64, %s25_s26, [#allocation3]  }
  0x34   :  { %s922_s27 = smov [#allocation7]   ;;  %s923_s29 = smov [#allocation10]  }
  0x35   :  { %s47_s28 = sshll.u32 %s922_s27, 4  ;;  %s75_s30 = sshll.u32 %s923_s29, 4  ;;  %s48_s28 = int_to_ptr.vmem [resolvable:$true] %s47_s28  ;;  %s76_s30 = int_to_ptr.vmem [resolvable:$true] %s75_s30 }
  0x36   :  { %s843_s13 = scalar_lea.hbm %s1116_s3, 1024 }
  0x37   :  { %p844_p10 = scmp.ne.s32.totalorder %s1116_s3, %s843_s13  ;;  %p847_p11 = scmp.lt.u32.totalorder %s843_s13, %s1116_s3 }
  0x39   :  { %p849_p12 = pnand %p847_p11, %p844_p10 }
  0x3b   :  { %852 = shalt.err (!%p849_p12)
}
  0x3c   :  { %s853_s0 = scalar_lea.vmem %s48_s28, 1024  ;;  %p858_p0 = scmp.lt.s32.totalorder %s48_s28, %s48_s28 }
  0x3d   :  { %p854_p13 = scmp.ne.s32.totalorder %s48_s28, %s853_s0  ;;  %p859_p1 = scmp.lt.s32.totalorder %s853_s0, %s853_s0 }
  0x3f   :  { %p860_p2 = por %p859_p1, %p858_p0 }
  0x41   :  { %p861_p3 = pnand %p860_p2, %p854_p13 }
  0x43   :  { %864 = shalt.err (!%p861_p3)
}
  0x44   :  { %53 = dma.hbm_to_vmem [thread:$0]  %s1116_s3, 1024, %s48_s28, [#allocation6], %s918_s19, %s918_s19, %s919_s20  }
  0x45   :  { %s865_s21 = scalar_lea.hbm %s1120_s7, 1024 }
  0x46   :  { %p866_p4 = scmp.ne.s32.totalorder %s1120_s7, %s865_s21  ;;  %p869_p5 = scmp.lt.u32.totalorder %s865_s21, %s1120_s7 }
  0x48   :  { %p871_p6 = pnand %p869_p5, %p866_p4 }
  0x4a   :  { %874 = shalt.err (!%p871_p6)
}
  0x4b   :  { %s875_s24 = scalar_lea.vmem %s76_s30, 1024  ;;  %p880_p8 = scmp.lt.s32.totalorder %s76_s30, %s76_s30 }
  0x4c   :  { %p876_p7 = scmp.ne.s32.totalorder %s76_s30, %s875_s24  ;;  %p881_p9 = scmp.lt.s32.totalorder %s875_s24, %s875_s24 }
  0x4e   :  { %p882_p10 = por %p881_p9, %p880_p8 }
  0x50   :  { %p883_p11 = pnand %p882_p10, %p876_p7 }
  0x52   :  { %886 = shalt.err (!%p883_p11)
}
  0x53   :  { %81 = dma.hbm_to_vmem [thread:$0]  %s1120_s7, 1024, %s76_s30, [#allocation9], %s918_s19, %s918_s19, %s919_s20  }
  0x54   :  { %909 = dma.done.wait [#allocation3], 64  }
  0x55   :  { %910 = vsyncadd [#allocation3], 4294967232 }
  0x56   :  { %911 = dma.done.wait [#allocation6], 2048  }
  0x57   :  { %912 = vsyncadd [#allocation6], 4294965248 }
  0x58   :  { %913 = dma.done.wait [#allocation9], 2048  }
  0x59   :  { %914 = vsyncadd [#allocation9], 4294965248  ;;  %v924_v0 = vmov 0.0   ;;  %vm925_vm0 = vmmov 0   ;;  %v741_v1 = vld [vmem:[#allocation5] sm:$0xff]   ;;  %v742_v2 = vld [vmem:[#allocation5 + $0x8] sm:$0xff]  }
  0x5a   :  { %651 = vmatprep.subr.bf16.mxu0 %v924_v0  ;;  %667 = vmatprep.mubr.msk.bf16.mxu0 %vm925_vm0, %v924_v0  ;;  %v743_v3 = vld [vmem:[#allocation5 + $0x10] sm:$0xff]   ;;  %v749_v4 = vld [vmem:[#allocation7] sm:$0xff]   ;;  %v744_v5 = vld [vmem:[#allocation5 + $0x18] sm:$0xff]  }
  0x5b   :  { %671 = vmatprep.subr.bf16.mxu1 %v924_v0  ;;  %687 = vmatprep.mubr.msk.bf16.mxu1 %vm925_vm0, %v924_v0  ;;  %v750_v6 = vld [vmem:[#allocation7 + $0x8] sm:$0xff]   ;;  %v745_v7 = vld [vmem:[#allocation5 + $0x20] sm:$0xff]   ;;  %v751_v8 = vld [vmem:[#allocation7 + $0x10] sm:$0xff]  }
  0x5c   :  { %652 = vmatpush3.bf16.msra.mxu0 %v741_v1  ;;  %672 = vmatpush3.bf16.msra.mxu1 %v749_v4  ;;  %v746_v9 = vld [vmem:[#allocation5 + $0x28] sm:$0xff]   ;;  %v752_v10 = vld [vmem:[#allocation7 + $0x18] sm:$0xff]   ;;  %v747_v11 = vld [vmem:[#allocation5 + $0x30] sm:$0xff]  }
  0x5d   :  { %653 = vmatprep.subr.bf16.mxu0 %v924_v0  ;;  %673 = vmatprep.subr.bf16.mxu1 %v924_v0  ;;  %v753_v12 = vld [vmem:[#allocation7 + $0x20] sm:$0xff]   ;;  %v748_v13 = vld [vmem:[#allocation5 + $0x38] sm:$0xff]   ;;  %v754_v14 = vld [vmem:[#allocation7 + $0x28] sm:$0xff]  }
  0x5e   :  { %v100_v15 = vld [vmem:[#allocation2] sm:$0xf]  ;;  %v755_v16 = vld [vmem:[#allocation7 + $0x30] sm:$0xff]   ;;  %v757_v18 = vld [vmem:[#allocation8] sm:$0xff]  }
  0x5f   :  { %v756_v17 = vld [vmem:[#allocation7 + $0x38] sm:$0xff]   ;;  %v758_v19 = vld [vmem:[#allocation8 + $0x8] sm:$0xff]   ;;  %v759_v20 = vld [vmem:[#allocation8 + $0x10] sm:$0xff]  }
  0x60   :  { %654 = vmatpush3.bf16.msra.mxu0 %v742_v2  ;;  %674 = vmatpush3.bf16.msra.mxu1 %v750_v6  ;;  %v760_v21 = vld [vmem:[#allocation8 + $0x18] sm:$0xff]   ;;  %v761_v22 = vld [vmem:[#allocation8 + $0x20] sm:$0xff]   ;;  %v762_v23 = vld [vmem:[#allocation8 + $0x28] sm:$0xff]  }
  0x61   :  { %655 = vmatprep.subr.bf16.mxu0 %v924_v0  ;;  %675 = vmatprep.subr.bf16.mxu1 %v924_v0  ;;  %v579_v24 = vld [vmem:[%s1115_s2] ss:$0 sm:$0xff]  ;;  %v763_v32 = vld [vmem:[#allocation8 + $0x30] sm:$0xff]   ;;  %v765_v34 = vld [vmem:[#allocation10] sm:$0xff]  }
  0x62   :  { %v764_v33 = vld [vmem:[#allocation8 + $0x38] sm:$0xff]   ;;  %v766_v35 = vld [vmem:[#allocation10 + $0x8] sm:$0xff]   ;;  %v767_v36 = vld [vmem:[#allocation10 + $0x10] sm:$0xff]  }
  0x63   :  { %v768_v37 = vld [vmem:[#allocation10 + $0x18] sm:$0xff]   ;;  %v769_v38 = vld [vmem:[#allocation10 + $0x20] sm:$0xff]   ;;  %v770_v39 = vld [vmem:[#allocation10 + $0x28] sm:$0xff]  }
  0x64   :  { %656 = vmatpush3.bf16.msra.mxu0 %v743_v3  ;;  %676 = vmatpush3.bf16.msra.mxu1 %v751_v8  ;;  %v588_v40 = vld [vmem:[%s1117_s4] ss:$0 sm:$0xff]  ;;  %v771_v48 = vld [vmem:[#allocation10 + $0x30] sm:$0xff]  }
  0x65   :  { %657 = vmatprep.subr.bf16.mxu0 %v924_v0  ;;  %677 = vmatprep.subr.bf16.mxu1 %v924_v0  ;;  %v772_v49 = vld [vmem:[#allocation10 + $0x38] sm:$0xff]  }
  0x66   :  { %v597_v50 = vld [vmem:[%s1119_s6] ss:$0 sm:$0xff]  ;;  %s926_s6 = smov [#allocation11]  }
  0x67   :  { %v606_v59 = vld [vmem:[%s1121_s8] ss:$0 sm:$0xff]  ;;  %s568_s11 = sshll.u32 %s926_s6, 4  ;;  %s569_s11 = int_to_ptr.vmem [resolvable:$true] %s568_s11 }
  0x68   :  { %658 = vmatpush3.bf16.msra.mxu0 %v744_v5  ;;  %678 = vmatpush3.bf16.msra.mxu1 %v752_v10  ;;  %s887_s8 = scalar_lea.vmem %s569_s11, 128  ;;  %p892_p13 = scmp.lt.s32.totalorder %s569_s11, %s569_s11 }
  0x69   :  { %659 = vmatprep.subr.bf16.mxu0 %v924_v0  ;;  %679 = vmatprep.subr.bf16.mxu1 %v924_v0  ;;  %p888_p12 = scmp.ne.s32.totalorder %s569_s11, %s887_s8  ;;  %p893_p0 = scmp.lt.s32.totalorder %s887_s8, %s887_s8 }
  0x6b   :  { %p894_p1 = por %p893_p0, %p892_p13 }
  0x6c   :  { %660 = vmatpush3.bf16.msra.mxu0 %v745_v7  ;;  %680 = vmatpush3.bf16.msra.mxu1 %v753_v12 }
  0x6d   :  { %661 = vmatprep.subr.bf16.mxu0 %v924_v0  ;;  %681 = vmatprep.subr.bf16.mxu1 %v924_v0  ;;  %p895_p2 = pnand %p894_p1, %p888_p12 }
  0x70   :  { %662 = vmatpush3.bf16.msra.mxu0 %v746_v9  ;;  %682 = vmatpush3.bf16.msra.mxu1 %v754_v14 }
  0x71   :  { %663 = vmatprep.subr.bf16.mxu0 %v924_v0  ;;  %683 = vmatprep.subr.bf16.mxu1 %v924_v0 }
  0x74   :  { %664 = vmatpush3.bf16.msra.mxu0 %v747_v11  ;;  %684 = vmatpush3.bf16.msra.mxu1 %v755_v16 }
  0x75   :  { %665 = vmatprep.subr.bf16.mxu0 %v924_v0  ;;  %685 = vmatprep.subr.bf16.mxu1 %v924_v0 }
  0x78   :  { %666 = vmatpush3.bf16.msra.mxu0 %v748_v13  ;;  %686 = vmatpush3.bf16.msra.mxu1 %v756_v17 }
  0x79   :  { %691 = vmatprep.subr.bf16.mxu0 %v924_v0  ;;  %711 = vmatprep.subr.bf16.mxu1 %v924_v0 }
  0x7b   :  { %668 = vmatmul.mubr.bf16.vlgmr.msra.gmra.mrb[0].mxu0 %v100_v15 }
  0x7c   :  { %707 = vmatprep.mubr.msk.bf16.mxu0 %vm925_vm0, %v924_v0  ;;  %692 = vmatpush3.bf16.msra.mxu0 %v757_v18 }
  0x7d   :  { %693 = vmatprep.subr.bf16.mxu0 %v924_v0 }
  0x80   :  { %694 = vmatpush3.bf16.msra.mxu0 %v758_v19 }
  0x81   :  { %695 = vmatprep.subr.bf16.mxu0 %v924_v0 }
  0x84   :  { %696 = vmatpush3.bf16.msra.mxu0 %v759_v20 }
  0x85   :  { %697 = vmatprep.subr.bf16.mxu0 %v924_v0 }
  0x88   :  { %698 = vmatpush3.bf16.msra.mxu0 %v760_v21 }
  0x89   :  { %699 = vmatprep.subr.bf16.mxu0 %v924_v0 }
  0x8c   :  { %700 = vmatpush3.bf16.msra.mxu0 %v761_v22 }
  0x8d   :  { %701 = vmatprep.subr.bf16.mxu0 %v924_v0 }
  0x90   :  { %702 = vmatpush3.bf16.msra.mxu0 %v762_v23 }
  0x91   :  { %703 = vmatprep.subr.bf16.mxu0 %v924_v0 }
  0x94   :  { %704 = vmatpush3.bf16.msra.mxu0 %v763_v32 }
  0x95   :  { %705 = vmatprep.subr.bf16.mxu0 %v924_v0 }
  0x98   :  { %706 = vmatpush3.bf16.msra.mxu0 %v764_v33 }
 0x14e   :  { %v206_v25 = vpop.f32.mrb[0].mxu0 }
 0x14f   :  { %v207_v26 = vadd.f32 %v579_v24, %v206_v25  ;;  %v669_v27 = vpop.f32.mrb[1].mxu0 }
 0x150   :  { %v209_v28 = vpop.f32.mrb[2].mxu0 }
 0x151   :  { %v212_v29 = vmax.f32 %v207_v26, 0.0  ;;  %v670_v30 = vpop.f32.mrb[3].mxu0 }
 0x153   :  { %v213_v31 = vpack.c.bf16 %v212_v29, %v212_v29 }
 0x155   :  { %688 = vmatmul.mubr.bf16.vlgmr.msra.gmra.mrb[0].mxu1 %v213_v31 }
 0x156   :  { %727 = vmatprep.mubr.msk.bf16.mxu1 %vm925_vm0, %v924_v0  ;;  %712 = vmatpush3.bf16.msra.mxu1 %v765_v34 }
 0x157   :  { %713 = vmatprep.subr.bf16.mxu1 %v924_v0 }
 0x15a   :  { %714 = vmatpush3.bf16.msra.mxu1 %v766_v35 }
 0x15b   :  { %715 = vmatprep.subr.bf16.mxu1 %v924_v0 }
 0x15e   :  { %716 = vmatpush3.bf16.msra.mxu1 %v767_v36 }
 0x15f   :  { %717 = vmatprep.subr.bf16.mxu1 %v924_v0 }
 0x162   :  { %718 = vmatpush3.bf16.msra.mxu1 %v768_v37 }
 0x163   :  { %719 = vmatprep.subr.bf16.mxu1 %v924_v0 }
 0x166   :  { %720 = vmatpush3.bf16.msra.mxu1 %v769_v38 }
 0x167   :  { %721 = vmatprep.subr.bf16.mxu1 %v924_v0 }
 0x16a   :  { %722 = vmatpush3.bf16.msra.mxu1 %v770_v39 }
 0x16b   :  { %723 = vmatprep.subr.bf16.mxu1 %v924_v0 }
 0x16e   :  { %724 = vmatpush3.bf16.msra.mxu1 %v771_v48 }
 0x16f   :  { %725 = vmatprep.subr.bf16.mxu1 %v924_v0 }
 0x172   :  { %726 = vmatpush3.bf16.msra.mxu1 %v772_v49 }
 0x228   :  { %v319_v41 = vpop.f32.mrb[0].mxu1 }
 0x229   :  { %v320_v42 = vadd.f32 %v588_v40, %v319_v41  ;;  %v689_v43 = vpop.f32.mrb[1].mxu1 }
 0x22a   :  { %v322_v44 = vpop.f32.mrb[2].mxu1 }
 0x22b   :  { %v325_v45 = vmax.f32 %v320_v42, 0.0  ;;  %v690_v46 = vpop.f32.mrb[3].mxu1 }
 0x22d   :  { %v326_v47 = vpack.c.bf16 %v325_v45, %v325_v45 }
 0x22f   :  { %708 = vmatmul.mubr.bf16.vlgmr.msra.gmra.mrb[4].mxu0 %v326_v47 }
 0x302   :  { %v432_v51 = vpop.f32.mrb[4].mxu0 }
 0x303   :  { %v433_v52 = vadd.f32 %v597_v50, %v432_v51  ;;  %v709_v53 = vpop.f32.mrb[5].mxu0 }
 0x304   :  { %v435_v54 = vpop.f32.mrb[6].mxu0 }
 0x305   :  { %v438_v55 = vadd.f32 %v433_v52, %v212_v29  ;;  %v710_v56 = vpop.f32.mrb[7].mxu0 }
 0x307   :  { %v439_v57 = vmax.f32 %v438_v55, 0.0 }
 0x309   :  { %v440_v58 = vpack.c.bf16 %v439_v57, %v439_v57 }
 0x30b   :  { %728 = vmatmul.mubr.bf16.vlgmr.msra.gmra.mrb[4].mxu1 %v440_v58 }
 0x3de   :  { %v546_v60 = vpop.f32.mrb[4].mxu1 }
 0x3df   :  { %v547_v61 = vadd.f32 %v606_v59, %v546_v60  ;;  %v729_v62 = vpop.f32.mrb[5].mxu1 }
 0x3e0   :  { %v549_v63 = vpop.f32.mrb[6].mxu1 }
 0x3e1   :  { %552 = vmax.xlane.f32.xlu0 %v547_v61  ;;  %v730_v0 = vpop.f32.mrb[7].mxu1 }
 0x46e   :  { %v553_v1 = vpop.xlane.xlu0 %552 }
 0x46f   :  { %v554_v2 = vsub.f32 %v547_v61, %v553_v1 }
 0x471   :  { %v555_v3 = vmul.f32 1.442695, %v554_v2 }
 0x473   :  { %773 = vpow2.f32 %v555_v3 }
 0x47d   :  { %v774_v4 = vpop.eup %773 }
 0x47e   :  { %557 = vadd.xlane.f32.xlu0 %v774_v4 }
 0x50b   :  { %v558_v5 = vpop.xlane.xlu0 %557 }
 0x50c   :  { %775 = vrcp.f32 %v558_v5 }
 0x516   :  { %v776_v6 = vpop.eup %775 }
 0x517   :  { %v560_v7 = vmul.f32 %v776_v6, %v774_v4 }
 0x519   :  { %561 = vst [vmem:[#allocation11] sm:$0xff] %v560_v7 }
 0x51a   :  { %898 = shalt.err (!%p895_p2)
}
 0x51b   :  { %s899_s1 = scalar_lea.hbm %s1122_s9, 128 }
 0x51c   :  { %p900_p3 = scmp.ne.s32.totalorder %s1122_s9, %s899_s1  ;;  %p903_p4 = scmp.lt.u32.totalorder %s899_s1, %s1122_s9 }
 0x51e   :  { %p905_p5 = pnand %p903_p4, %p900_p3 }
 0x520   :  { %908 = shalt.err (!%p905_p5)
}
 0x521   :  { %571 = dma.vmem_to_hbm [thread:$0]  %s569_s11, 128, %s1122_s9, [#allocation4]  }
 0x522   :  { %915 = dma.done.wait [#allocation4], 128  }
 0x523   :  { %916 = vsyncadd [#allocation4], 4294967168 }
 0x524   :  { %575 = vsyncpa [#allocation3], 1 }
 0x525   :  { %576 = vsyncpa [#allocation6], 1 }
 0x526   :  { %577 = vsyncpa [#allocation9], 1 }
 0x527   :  { %578 = vsyncpa [#allocation4], 1 }

</bundles_post_ra>
